<compile_context>
chip_gen: v5e
topology: v5e:2x2
jax: 0.10.0
libtpu: 0.0.40
codegen_flags: <defaults>
</compile_context>

<pallas_src>
import jax
import jax.numpy as jnp
from jax import lax
from jax.experimental import pallas as pl
from jax.experimental.pallas import tpu as pltpu


def _self_attention_kernel(xq_ref, xkv_ref, wq_ref, wkv_ref, bq_ref, bkv_ref,
                           o_ref, m_sc, l_sc, acc_sc):
    ki = pl.program_id(2)
    A = wq_ref.shape[0]

    @pl.when(ki == 0)
    def _init():
        m_sc[...] = jnp.full_like(m_sc, -jnp.inf)
        l_sc[...] = jnp.zeros_like(l_sc)
        acc_sc[...] = jnp.zeros_like(acc_sc)

    xq = xq_ref[0]                                     # (C, Tq)  bf16
    xkv = xkv_ref[0]                                   # (C, Tk)  bf16

    # 1x1-conv projections == channel matmuls (bf16 MXU, f32 accumulation).
    # K and V share the kv-tile columns, so their weights are fused in one dot.
    q = (jnp.dot(wq_ref[...], xq, preferred_element_type=jnp.float32)
         + bq_ref[...])                                # (A, Tq)   f32
    kv = (jnp.dot(wkv_ref[...], xkv, preferred_element_type=jnp.float32)
          + bkv_ref[...])                              # (A+C, Tk) f32
    q_b = q.astype(jnp.bfloat16)
    k_b = kv[:A].astype(jnp.bfloat16)                  # (A, Tk)
    v_b = kv[A:].astype(jnp.bfloat16)                  # (C, Tk)

    # scores s[m, n] = sum_a K[a, m] Q[a, n]  (kv index m on sublanes, query n
    # on lanes) -- keeps the PV matmul below in plain MXU orientation.
    s = lax.dot_general(k_b, q_b, (((0,), (0,)), ((), ())),
                        preferred_element_type=jnp.float32)          # (Tk, Tq)

    # Online softmax over m (f32 statistics), unnormalized accumulation.
    m_new = jnp.maximum(m_sc[...], jnp.max(s, axis=0, keepdims=True))  # (1, Tq)
    alpha = jnp.exp(m_sc[...] - m_new)                                 # (1, Tq)
    p = jnp.exp(s - m_new)                                             # (Tk, Tq) f32
    l_sc[...] = alpha * l_sc[...] + jnp.sum(p, axis=0, keepdims=True)
    acc_sc[...] = alpha * acc_sc[...] + lax.dot_general(
        v_b, p.astype(jnp.bfloat16), (((1,), (0,)), ((), ())),
        preferred_element_type=jnp.float32)                            # (C, Tq)
    m_sc[...] = m_new

    @pl.when(ki == pl.num_programs(2) - 1)
    def _finalize():
        # Normalize once on the small (C, Tq) tile; exact divide (no approx recip).
        o_ref[0] = (acc_sc[...] / l_sc[...]).astype(o_ref.dtype)


def _pick_spatial_tile(n, max_tile=512):
    """Largest tile <= max_tile dividing n, keeping the lane dim legal
    (multiple of 128, or the full dim)."""
    if n <= max_tile:
        return n
    for t in (512, 384, 256, 128):
        if t <= max_tile and n % t == 0:
            return t
    # TODO(synk): for large N not divisible by 128, pad N to a 128-multiple with
    # -inf score masking instead of falling back to a monolithic (N, N) block.
    return n


def self_attention_pallas(x_nchw, wq, bq, wk, bk, wv, bv, *, max_tile=512):
    """x_nchw: (B, C, H, W).  Conv2d 1x1 weights with kernel dims squeezed:
       wq, wk: (A, C); wv: (C, C); biases 1-D."""
    B, C, H, W = x_nchw.shape
    A = wq.shape[0]
    N = H * W

    # Pure reshape (no transpose): NCHW -> (B, C, N); N lands in the lane dim.
    # bf16 inputs halve the kernel's HBM->VMEM traffic; accumulation stays f32.
    x_seq = x_nchw.reshape(B, C, N).astype(jnp.bfloat16)

    wq_b = wq.astype(jnp.bfloat16)                                    # (A, C)
    wkv_b = jnp.concatenate([wk, wv], axis=0).astype(jnp.bfloat16)    # (A+C, C)
    bq_c = bq.reshape(A, 1).astype(jnp.float32)
    bkv_c = jnp.concatenate([bk, bv], axis=0).reshape(A + C, 1).astype(jnp.float32)

    t = _pick_spatial_tile(N, max_tile)
    grid = (B, N // t, N // t)
    const = lambda b, qi, ki: (0, 0)

    out_seq = pl.pallas_call(
        _self_attention_kernel,
        out_shape=jax.ShapeDtypeStruct((B, C, N), x_nchw.dtype),
        grid=grid,
        in_specs=[
            pl.BlockSpec((1, C, t), lambda b, qi, ki: (b, 0, qi)),    # x (q-tile cols)
            pl.BlockSpec((1, C, t), lambda b, qi, ki: (b, 0, ki)),    # x (kv-tile cols)
            pl.BlockSpec((A, C), const),                              # Wq
            pl.BlockSpec((A + C, C), const),                          # [Wk; Wv]
            pl.BlockSpec((A, 1), const),                              # bq
            pl.BlockSpec((A + C, 1), const),                          # [bk; bv]
        ],
        out_specs=pl.BlockSpec((1, C, t), lambda b, qi, ki: (b, 0, qi)),
        scratch_shapes=[
            pltpu.VMEM((1, t), jnp.float32),      # running max
            pltpu.VMEM((1, t), jnp.float32),      # running sum
            pltpu.VMEM((C, t), jnp.float32),      # unnormalized output accumulator
        ],
        compiler_params=pltpu.CompilerParams(
            dimension_semantics=("parallel", "parallel", "arbitrary")),
    )(x_seq, x_seq, wq_b, wkv_b, bq_c, bkv_c)

    # Pure reshape back to NCHW (no transpose).
    return out_seq.reshape(B, C, H, W)


def _reference(x_nchw, wq, bq, wk, bk, wv, bv):
    """Pure-JAX f32 reference mirroring the PyTorch forward exactly."""
    B, C, H, W = x_nchw.shape
    N = H * W
    x = x_nchw.reshape(B, C, N)                                        # (B, C, N)
    q = jnp.einsum('ac,bcn->ban', wq, x) + bq[None, :, None]            # (B, A, N)
    k = jnp.einsum('ac,bcn->ban', wk, x) + bk[None, :, None]            # (B, A, N)
    v = jnp.einsum('oc,bcn->bon', wv, x) + bv[None, :, None]            # (B, C, N)
    attn = jax.nn.softmax(jnp.einsum('ban,bam->bnm', q, k), axis=-1)    # (B, N, N)
    out = jnp.einsum('bcm,bnm->bcn', v, attn)                           # (B, C, N)
    return out.reshape(B, C, H, W)


if __name__ == "__main__":
    # Small shapes consistent with the module: B=2, C=4 channels, 16x16 spatial,
    # attention_dim=8.
    B, C, H, W = 2, 4, 16, 16
    A = 8

    key = jax.random.PRNGKey(0)
    kx, kq, kbq, kk, kbk, kv, kbv = jax.random.split(key, 7)

    x = jax.random.normal(kx, (B, C, H, W), dtype=jnp.float32)

    # Deterministic synthetic parameters (Conv2d 1x1 weights, kernel dims squeezed).
    wq = jax.random.normal(kq, (A, C), dtype=jnp.float32) * 0.3
    bq = jax.random.normal(kbq, (A,), dtype=jnp.float32) * 0.1
    wk = jax.random.normal(kk, (A, C), dtype=jnp.float32) * 0.3
    bk = jax.random.normal(kbk, (A,), dtype=jnp.float32) * 0.1
    wv = jax.random.normal(kv, (C, C), dtype=jnp.float32) * 0.3
    bv = jax.random.normal(kbv, (C,), dtype=jnp.float32) * 0.1

    out = self_attention_pallas(x, wq, bq, wk, bk, wv, bv)
    out = jax.block_until_ready(out)

    ref = _reference(x, wq, bq, wk, bk, wv, bv)
    assert out.shape == (B, C, H, W)
    # bf16 MXU operands (f32 accumulation / f32 softmax stats) drift ~1e-2 vs the
    # pure-f32 reference, as anticipated in the review.
    assert jnp.allclose(out, ref, atol=3e-2, rtol=3e-2), "mismatch vs reference"

    print("KERNEL_OK")
</pallas_src>

<mosaic_0001>
module attributes {stable_mosaic.version = 11 : i64} {
  func.func @_self_attention_kernel(%arg0: i32, %arg1: i32, %arg2: i32, %arg3: memref<1x4x256xbf16, #tpu.memory_space<vmem>>, %arg4: memref<1x4x256xbf16, #tpu.memory_space<vmem>>, %arg5: memref<8x4xbf16, #tpu.memory_space<vmem>>, %arg6: memref<12x4xbf16, #tpu.memory_space<vmem>>, %arg7: memref<8x1xf32, #tpu.memory_space<vmem>>, %arg8: memref<12x1xf32, #tpu.memory_space<vmem>>, %arg9: memref<1x4x256xf32, #tpu.memory_space<vmem>>, %arg10: memref<1x256xf32, #tpu.memory_space<vmem>>, %arg11: memref<1x256xf32, #tpu.memory_space<vmem>>, %arg12: memref<4x256xf32, #tpu.memory_space<vmem>>) attributes {dimension_semantics = [#tpu.dimension_semantics<parallel>, #tpu.dimension_semantics<parallel>, #tpu.dimension_semantics<arbitrary>], iteration_bounds = array<i64: 2, 1, 1>, scalar_prefetch = 0 : i64, scratch_operands = 3 : i64, tpu.core_type = #tpu.core_type<tc>, window_params = [{transform_indices = @transform_0, window_bounds = array<i64: 1, 4, 256>}, {transform_indices = @transform_1, window_bounds = array<i64: 1, 4, 256>}, {pipeline_mode = #tpu.pipeline_mode<synchronous>, transform_indices = @transform_2, window_bounds = array<i64: 8, 4>}, {pipeline_mode = #tpu.pipeline_mode<synchronous>, transform_indices = @transform_3, window_bounds = array<i64: 12, 4>}, {pipeline_mode = #tpu.pipeline_mode<synchronous>, transform_indices = @transform_4, window_bounds = array<i64: 8, 1>}, {pipeline_mode = #tpu.pipeline_mode<synchronous>, transform_indices = @transform_5, window_bounds = array<i64: 12, 1>}, {transform_indices = @transform_6, window_bounds = array<i64: 1, 4, 256>}]} {
    %c0_i32 = arith.constant 0 : i32
    %0 = arith.cmpi eq, %arg2, %c0_i32 : i32
    %1 = arith.extui %0 : i1 to i32
    %c0_i32_0 = arith.constant 0 : i32
    %2 = arith.cmpi ne, %1, %c0_i32_0 : i32
    scf.if %2 {
      %cst_35 = arith.constant 0xFF800000 : f32
      %50 = vector.broadcast %cst_35 : f32 to vector<1x256xf32>
      %c0_36 = arith.constant 0 : index
      %c0_37 = arith.constant 0 : index
      %51 = vector.load %arg10[%c0_36, %c0_37] : memref<1x256xf32, #tpu.memory_space<vmem>>, vector<1x256xf32>
      tpu.vector_store %arg10[%c0_36, %c0_37], %50 {strides = array<i32>} : memref<1x256xf32, #tpu.memory_space<vmem>>, vector<1x256xf32>,
      %cst_38 = arith.constant 0.000000e+00 : f32
      %52 = vector.broadcast %cst_38 : f32 to vector<1x256xf32>
      %c0_39 = arith.constant 0 : index
      %c0_40 = arith.constant 0 : index
      %53 = vector.load %arg11[%c0_39, %c0_40] : memref<1x256xf32, #tpu.memory_space<vmem>>, vector<1x256xf32>
      tpu.vector_store %arg11[%c0_39, %c0_40], %52 {strides = array<i32>} : memref<1x256xf32, #tpu.memory_space<vmem>>, vector<1x256xf32>,
      %cst_41 = arith.constant 0.000000e+00 : f32
      %54 = vector.broadcast %cst_41 : f32 to vector<4x256xf32>
      %c0_42 = arith.constant 0 : index
      %c0_43 = arith.constant 0 : index
      %55 = vector.load %arg12[%c0_42, %c0_43] : memref<4x256xf32, #tpu.memory_space<vmem>>, vector<4x256xf32>
      tpu.vector_store %arg12[%c0_42, %c0_43], %54 {strides = array<i32>} : memref<4x256xf32, #tpu.memory_space<vmem>>, vector<4x256xf32>,
    } else {
    }
    %c0 = arith.constant 0 : index
    %c0_1 = arith.constant 0 : index
    %c0_2 = arith.constant 0 : index
    %3 = vector.load %arg3[%c0, %c0_1, %c0_2] : memref<1x4x256xbf16, #tpu.memory_space<vmem>>, vector<1x4x256xbf16>
    %4 = vector.shape_cast %3 : vector<1x4x256xbf16> to vector<4x256xbf16>
    %c0_3 = arith.constant 0 : index
    %c0_4 = arith.constant 0 : index
    %c0_5 = arith.constant 0 : index
    %5 = vector.load %arg4[%c0_3, %c0_4, %c0_5] : memref<1x4x256xbf16, #tpu.memory_space<vmem>>, vector<1x4x256xbf16>
    %6 = vector.shape_cast %5 : vector<1x4x256xbf16> to vector<4x256xbf16>
    %c0_6 = arith.constant 0 : index
    %c0_7 = arith.constant 0 : index
    %7 = vector.load %arg5[%c0_6, %c0_7] : memref<8x4xbf16, #tpu.memory_space<vmem>>, vector<8x4xbf16>
    %cst = arith.constant dense<0.000000e+00> : vector<8x256xf32>
    %8 = tpu.matmul %7, %4, %cst {dimension_numbers = #tpu.dot_dimension_numbers<[1], [0], [0], [1], [0, 0, 1, 1], [], []>} : vector<8x4xbf16>, vector<4x256xbf16>, vector<8x256xf32> -> vector<8x256xf32>
    %c0_8 = arith.constant 0 : index
    %c0_9 = arith.constant 0 : index
    %9 = vector.load %arg7[%c0_8, %c0_9] : memref<8x1xf32, #tpu.memory_space<vmem>>, vector<8x1xf32>
    %10 = vector.broadcast %9 : vector<8x1xf32> to vector<8x256xf32>
    %11 = arith.addf %8, %10 : vector<8x256xf32>
    %c0_10 = arith.constant 0 : index
    %c0_11 = arith.constant 0 : index
    %12 = vector.load %arg6[%c0_10, %c0_11] : memref<12x4xbf16, #tpu.memory_space<vmem>>, vector<12x4xbf16>
    %cst_12 = arith.constant dense<0.000000e+00> : vector<12x256xf32>
    %13 = tpu.matmul %12, %6, %cst_12 {dimension_numbers = #tpu.dot_dimension_numbers<[1], [0], [0], [1], [0, 0, 1, 1], [], []>} : vector<12x4xbf16>, vector<4x256xbf16>, vector<12x256xf32> -> vector<12x256xf32>
    %c0_13 = arith.constant 0 : index
    %c0_14 = arith.constant 0 : index
    %14 = vector.load %arg8[%c0_13, %c0_14] : memref<12x1xf32, #tpu.memory_space<vmem>>, vector<12x1xf32>
    %15 = vector.broadcast %14 : vector<12x1xf32> to vector<12x256xf32>
    %16 = arith.addf %13, %15 : vector<12x256xf32>
    %17 = arith.truncf %11 : vector<8x256xf32> to vector<8x256xbf16>
    %18 = vector.extract_strided_slice %16 {offsets = [0, 0], sizes = [8, 256], strides = [1, 1]} : vector<12x256xf32> to vector<8x256xf32>
    %19 = arith.truncf %18 : vector<8x256xf32> to vector<8x256xbf16>
    %20 = vector.extract_strided_slice %16 {offsets = [8, 0], sizes = [4, 256], strides = [1, 1]} : vector<12x256xf32> to vector<4x256xf32>
    %21 = arith.truncf %20 : vector<4x256xf32> to vector<4x256xbf16>
    %cst_15 = arith.constant dense<0.000000e+00> : vector<256x256xf32>
    %22 = tpu.matmul %19, %17, %cst_15 {dimension_numbers = #tpu.dot_dimension_numbers<[0], [0], [1], [1], [0, 1, 1, 1], [], []>} : vector<8x256xbf16>, vector<8x256xbf16>, vector<256x256xf32> -> vector<256x256xf32>
    %c0_16 = arith.constant 0 : index
    %c0_17 = arith.constant 0 : index
    %23 = vector.load %arg10[%c0_16, %c0_17] : memref<1x256xf32, #tpu.memory_space<vmem>>, vector<1x256xf32>
    %cst_18 = arith.constant dense<0xFF800000> : vector<256xf32>
    %24 = vector.multi_reduction <maximumf>, %22, %cst_18 [0] : vector<256x256xf32> to vector<256xf32>
    %25 = vector.shape_cast %24 : vector<256xf32> to vector<1x256xf32>
    %26 = arith.maximumf %23, %25 : vector<1x256xf32>
    %c0_19 = arith.constant 0 : index
    %c0_20 = arith.constant 0 : index
    %27 = vector.load %arg10[%c0_19, %c0_20] : memref<1x256xf32, #tpu.memory_space<vmem>>, vector<1x256xf32>
    %28 = arith.subf %27, %26 : vector<1x256xf32>
    %29 = math.exp %28 : vector<1x256xf32>
    %30 = vector.broadcast %26 : vector<1x256xf32> to vector<256x256xf32>
    %31 = arith.subf %22, %30 : vector<256x256xf32>
    %32 = math.exp %31 : vector<256x256xf32>
    %c0_21 = arith.constant 0 : index
    %c0_22 = arith.constant 0 : index
    %33 = vector.load %arg11[%c0_21, %c0_22] : memref<1x256xf32, #tpu.memory_space<vmem>>, vector<1x256xf32>
    %34 = arith.mulf %29, %33 : vector<1x256xf32>
    %cst_23 = arith.constant dense<0.000000e+00> : vector<256xf32>
    %35 = vector.multi_reduction <add>, %32, %cst_23 [0] : vector<256x256xf32> to vector<256xf32>
    %36 = vector.shape_cast %35 : vector<256xf32> to vector<1x256xf32>
    %37 = arith.addf %34, %36 : vector<1x256xf32>
    %c0_24 = arith.constant 0 : index
    %c0_25 = arith.constant 0 : index
    %38 = vector.load %arg11[%c0_24, %c0_25] : memref<1x256xf32, #tpu.memory_space<vmem>>, vector<1x256xf32>
    tpu.vector_store %arg11[%c0_24, %c0_25], %37 {strides = array<i32>} : memref<1x256xf32, #tpu.memory_space<vmem>>, vector<1x256xf32>,
    %c0_26 = arith.constant 0 : index
    %c0_27 = arith.constant 0 : index
    %39 = vector.load %arg12[%c0_26, %c0_27] : memref<4x256xf32, #tpu.memory_space<vmem>>, vector<4x256xf32>
    %40 = vector.broadcast %29 : vector<1x256xf32> to vector<4x256xf32>
    %41 = arith.mulf %40, %39 : vector<4x256xf32>
    %42 = arith.truncf %32 : vector<256x256xf32> to vector<256x256xbf16>
    %cst_28 = arith.constant dense<0.000000e+00> : vector<4x256xf32>
    %43 = tpu.matmul %21, %42, %cst_28 {dimension_numbers = #tpu.dot_dimension_numbers<[1], [0], [0], [1], [0, 0, 1, 1], [], []>} : vector<4x256xbf16>, vector<256x256xbf16>, vector<4x256xf32> -> vector<4x256xf32>
    %44 = arith.addf %41, %43 : vector<4x256xf32>
    %c0_29 = arith.constant 0 : index
    %c0_30 = arith.constant 0 : index
    %45 = vector.load %arg12[%c0_29, %c0_30] : memref<4x256xf32, #tpu.memory_space<vmem>>, vector<4x256xf32>
    tpu.vector_store %arg12[%c0_29, %c0_30], %44 {strides = array<i32>} : memref<4x256xf32, #tpu.memory_space<vmem>>, vector<4x256xf32>,
    %c0_31 = arith.constant 0 : index
    %c0_32 = arith.constant 0 : index
    %46 = vector.load %arg10[%c0_31, %c0_32] : memref<1x256xf32, #tpu.memory_space<vmem>>, vector<1x256xf32>
    tpu.vector_store %arg10[%c0_31, %c0_32], %26 {strides = array<i32>} : memref<1x256xf32, #tpu.memory_space<vmem>>, vector<1x256xf32>,
    %c0_i32_33 = arith.constant 0 : i32
    %47 = arith.cmpi eq, %arg2, %c0_i32_33 : i32
    %48 = arith.extui %47 : i1 to i32
    %c0_i32_34 = arith.constant 0 : i32
    %49 = arith.cmpi ne, %48, %c0_i32_34 : i32
    scf.if %49 {
      %c0_35 = arith.constant 0 : index
      %c0_36 = arith.constant 0 : index
      %50 = vector.load %arg12[%c0_35, %c0_36] : memref<4x256xf32, #tpu.memory_space<vmem>>, vector<4x256xf32>
      %c0_37 = arith.constant 0 : index
      %c0_38 = arith.constant 0 : index
      %51 = vector.load %arg11[%c0_37, %c0_38] : memref<1x256xf32, #tpu.memory_space<vmem>>, vector<1x256xf32>
      %52 = vector.broadcast %51 : vector<1x256xf32> to vector<4x256xf32>
      %53 = arith.divf %50, %52 : vector<4x256xf32>
      %c0_39 = arith.constant 0 : index
      %c0_40 = arith.constant 0 : index
      %c0_41 = arith.constant 0 : index
      %54 = vector.load %arg9[%c0_39, %c0_40, %c0_41] : memref<1x4x256xf32, #tpu.memory_space<vmem>>, vector<1x4x256xf32>
      %55 = vector.shape_cast %54 : vector<1x4x256xf32> to vector<4x256xf32>
      %56 = vector.shape_cast %53 : vector<4x256xf32> to vector<1x4x256xf32>
      tpu.vector_store %arg9[%c0_39, %c0_40, %c0_41], %56 {strides = array<i32>} : memref<1x4x256xf32, #tpu.memory_space<vmem>>, vector<1x4x256xf32>,
    } else {
    }
    return
  }
  func.func @transform_0(%arg0: i32, %arg1: i32, %arg2: i32) -> (i32, i32, i32) {
    %c0_i32 = arith.constant 0 : i32
    %c0_i32_0 = arith.constant 0 : i32
    return %arg0, %c0_i32, %arg1 : i32, i32, i32
  }
  func.func @transform_1(%arg0: i32, %arg1: i32, %arg2: i32) -> (i32, i32, i32) {
    %c0_i32 = arith.constant 0 : i32
    %c0_i32_0 = arith.constant 0 : i32
    return %arg0, %c0_i32, %arg2 : i32, i32, i32
  }
  func.func @transform_2(%arg0: i32, %arg1: i32, %arg2: i32) -> (i32, i32) {
    %c0_i32 = arith.constant 0 : i32
    %c0_i32_0 = arith.constant 0 : i32
    %c0_i32_1 = arith.constant 0 : i32
    return %c0_i32, %c0_i32_0 : i32, i32
  }
  func.func @transform_3(%arg0: i32, %arg1: i32, %arg2: i32) -> (i32, i32) {
    %c0_i32 = arith.constant 0 : i32
    %c0_i32_0 = arith.constant 0 : i32
    %c0_i32_1 = arith.constant 0 : i32
    return %c0_i32, %c0_i32_0 : i32, i32
  }
  func.func @transform_4(%arg0: i32, %arg1: i32, %arg2: i32) -> (i32, i32) {
    %c0_i32 = arith.constant 0 : i32
    %c0_i32_0 = arith.constant 0 : i32
    %c0_i32_1 = arith.constant 0 : i32
    return %c0_i32, %c0_i32_0 : i32, i32
  }
  func.func @transform_5(%arg0: i32, %arg1: i32, %arg2: i32) -> (i32, i32) {
    %c0_i32 = arith.constant 0 : i32
    %c0_i32_0 = arith.constant 0 : i32
    %c0_i32_1 = arith.constant 0 : i32
    return %c0_i32, %c0_i32_0 : i32, i32
  }
  func.func @transform_6(%arg0: i32, %arg1: i32, %arg2: i32) -> (i32, i32, i32) {
    %c0_i32 = arith.constant 0 : i32
    %c0_i32_0 = arith.constant 0 : i32
    return %arg0, %c0_i32, %arg1 : i32, i32, i32
  }
}

</mosaic_0001>

<bundles_post_ra>
// kernel: tpu_custom_call.1
= control target key start
LH: loop header
LB: loop body
LE: loop exit
PB: predicated region body
PF: predicated region fallthrough
CT: control target
= control target key end

     0   :  { %11 = vsyncpa [#allocation6], 0  ;;  %s2445_s0 = inlined_call_operand.vmem [shape: bf16[2,4,256], index: 0, kind: input, shape index: {}]   ;;  %s2446_s1 = inlined_call_operand.vmem [shape: bf16[2,4,256], index: 1, kind: input, shape index: {}]   ;;  %s2447_s2 = inlined_call_operand.vmem [shape: bf16[8,4], index: 2, kind: input, shape index: {}]   ;;  %s2448_s3 = inlined_call_operand.vmem [shape: bf16[12,4], index: 3, kind: input, shape index: {}]   ;;  %s2449_s4 = inlined_call_operand.vmem [shape: f32[8,1], index: 4, kind: input, shape index: {}]   ;;  %s2450_s5 = inlined_call_operand.vmem [shape: f32[12,1], index: 5, kind: input, shape index: {}]   ;;  %s2451_s6 = inlined_call_operand.hbm [shape: f32[2,4,256], index: 6, kind: output, shape index: {}]  }
   0x1   :  { %13 = vsyncpa [#allocation6 + $0x1], 0  ;;  %s1696_s21 = smov 0   ;;  %s1698_s22 = smov 0  }
   0x2   :  { %s1700_s23 = smov 0   ;;  %s1702_s24 = smov 0  }
   0x3   :  { %s1704_s25 = smov 0   ;;  %s1706_s26 = smov 0  }
   0x4 LB: > { %s1325_s27 = sadd.s32 4294967295, %s1656_s26   ;;  %s1326_s28 = sadd.s32 4294967294, %s1656_s26   ;;  %s1656_s26 = sphi %s1706_s26, %s19_s26   ;;  %s1652_s25 = sphi %s1704_s25, %s2549_s25   ;;  %s1648_s24 = sphi %s1702_s24, %s2548_s24   ;;  %s1644_s23 = sphi %s1700_s23, %s2547_s23   ;;  %s1640_s22 = sphi %s1698_s22, %s2546_s22   ;;  %s1636_s21 = sphi %s1696_s21, %s2545_s21  }
   0x5   : > { %s38_s29 = sadd.s32 1, %s1652_s25  ;;  %s187_s30 = sadd.s32 1, %s1644_s23 }
   0x6   : > { %p40_p0 = scmp.ge.s32.totalorder %s38_s29, 2  ;;  %p197_p1 = scmp.ne.s32.totalorder %s1644_s23, %s1640_s22 }
   0x7   : > { %p198_p2 = scmp.eq.s32.totalorder %s1325_s27, 1  ;;  %p203_p3 = scmp.ne.s32.totalorder %s1640_s22, %s1636_s21 }
   0x8   : > { %s2551_s29 = smov (%p40_p0, %s38_s29), 0  ;;  %p204_p5 = scmp.eq.s32.totalorder %s1326_s28, 1 }
   0x9   : > { %p1736_p4 = por %p198_p2, %p197_p1  ;;  %s182_s8 = ssub.s32 %s1652_s25, %s2551_s29 }
   0xa   : > { %p1329_p6 = scmp.ge.s32.totalorder %s1656_s26, 1  ;;  %p185_p7 = scmp.eq.s32.totalorder %s182_s8, 0 }
   0xb   : > { %p1743_p8 = por %p204_p5, %p203_p3  ;;  %p260_p9 = scmp.lt.s32.totalorder %s1656_s26, 3 }
   0xc   : > { %s1749_s10 = scalar_select %p185_p7, %s1644_s23, %s187_s30  }
   0xd   : > { %p261_p10 = pnand %p1329_p6, %p260_p9 }
   0xf   : > { %264 = sbr.rel (%p261_p10) target bundleno = 935 (0x3a7), region = 44 }
  0x14   : > { %p304_p11 = scmp.lt.s32.totalorder %s1648_s24, 1  ;;  %v329_v0 = vlaneseq  ;;  %v386_v1 = vld [vmem:[%s2450_s5] sm:$0xff]  ;;  %v2481_v2 = vmov 0  ;;  %v1658_v3 = vmov 0   ;;  %v1659_v4 = vmov 0.0   ;;  %s1383_s19 = sshll.u32 %s1648_s24, 3 }
  0x15   : > { %1444 = vset.pattern.permute.xlu0 %v1658_v3  ;;  %v339_v6 = vld [vmem:[%s2449_s4] sm:$0xff]  ;;  %vm353_vm1 = vcmask 1041408   ;;  %vm349_vm2 = vcmask 31744   ;;  %vm521_vm3 = vcmask 1043456   ;;  %vm472_vm4 = vcmask 64512   ;;  %s1598_s16 = scalar_lea.hbm %s2451_s6, 16 }
  0x16   : > { %s305_s13 = scalar_select %p304_p11, %s1648_s24, 1  ;;  %vm1756_vm0 = vcmp.lt.s32.totalorder %v329_v0, 256  ;;  %390 = vperm.xlu0 %1444, %v386_v1   ;;  %v338_v12 = vld [vmem:[%s2447_s2] sm:$0xf]  ;;  %v1382_v14 = vld [vmem:[%s2448_s3] sm:$0x30] }
  0x17   : > { %v2482_v2 = vsel %vm1756_vm0, 4294967295, %v2481_v2  ;;  %334 = vst.msk [vmem:[#allocation3] sm:$0x3] %vm1756_vm0, %v1659_v4  ;;  %v1339_v13 = vld [vmem:[%s2448_s3] sm:$0xf]  ;;  %vm784_vm5 = vcmask 1040384  }
  0x18   : > { %2483 = vst [vmem:[#allocation8_spill] sm:$0xff] %v2482_v2  ;;  %s1380_s14 = sshll.u32 %s305_s13, 2  ;;  %v1340_v19 = vor.u32 %v1382_v14, %v1339_v13  ;;  %v387_v42 = vld [vmem:[%s2450_s5 + $0x8] sm:$0xf] }
  0x19   : > { %s311_s17 = scalar_lea.vmem %s2445_s0, %s1380_s14  ;;  %s321_s28 = scalar_lea.vmem %s2446_s1, %s1380_s14 }
  0x1a   : > { %v336_v5 = vld [vmem:[%s311_s17] sm:$0xf]  ;;  %s300_s17 = sand.u32 1, %s1640_s22  }
  0x1b   : > { %346 = vst [vmem:[#allocation1] ss:$4 sm:$0xff] %v336_v5  ;;  %v337_v7 = vld [vmem:[%s321_s28] sm:$0xf]  ;;  %s2403_s18 = sshll.u32 %s300_s17, 3  ;;  %s1223_s28 = scalar_lea.hbm %s2451_s6, %s1383_s19 }
  0x1c   : > { %s302_s24 = scalar_lea.vmem [#allocation5], %s2403_s18  ;;  %s1227_s8 = sshll.u32 %s1223_s28, 4  ;;  %s1228_s8 = int_to_ptr.hbm [resolvable:$true] %s1227_s8 }
  0x1d   : > { %s1225_s30 = sshll.u32 %s302_s24, 4  ;;  %s1210_s11 = scalar_lea.sflag [#allocation6], %s300_s17  ;;  %s1226_s30 = int_to_ptr.vmem [resolvable:$true] %s1225_s30 }
  0x1e   : > { %342 = vperm.xlu0 %1444, %v339_v6   ;;  %s1592_s12 = sshra.s32 %s1228_s8, 4  ;;  %s1593_s12 = int_to_ptr.hbm [resolvable:$true] %s1592_s12 }
  0x1f   : > { %s1594_s13 = scalar_lea.hbm %s1593_s12, 8  ;;  %p1599_p1 = scmp.lt.s32.totalorder %s1593_s12, %s2451_s6 }
  0x20   : > { %p1595_p12 = scmp.ne.s32.totalorder %s1593_s12, %s1594_s13  ;;  %p1600_p2 = scmp.lt.s32.totalorder %s1598_s16, %s1594_s13 }
  0x22   : > { %v347_v8 = vld.sshfl [vmem:[#allocation1] sm:$0xff pattern:$0x73625140]  ;;  %v348_v9 = vld.sshfl [vmem:[#allocation1 + $0x8] sm:$0xff pattern:$0x73625140]  ;;  %p1596_p13 = pnand %p1595_p12, %p1736_p4  ;;  %p1601_p3 = por %p1600_p2, %p1599_p1 }
  0x23   : > { %404 = vst [vmem:[#allocation1] ss:$4 sm:$0xff] %v337_v7  ;;  %v354_v10 = vsel %vm353_vm1, %v347_v8, 0  ;;  %v356_v11 = vsel %vm353_vm1, %v348_v9, 0 }
  0x24   : > { %365 = vmatpush.bf16.msra.mxu0 %v354_v10  ;;  %378 = vmatpush.bf16.msra.mxu1 %v356_v11  ;;  %p1597_p0 = pneg %p1596_p13 }
  0x26   : > { %p1602_p5 = pnand %p1601_p3, %p1597_p0 }
  0x27   : > { %1335 = vmatmul.msk.bf16.vlgmr.msra.gmra.mxu0 %vm349_vm2, %v338_v12  ;;  %1336 = vmatmul.msk.bf16.vlgmr.msra.gmra.mxu1 %vm349_vm2, %v338_v12 }
  0x2a   : > { %v405_v15 = vld.sshfl [vmem:[#allocation1] sm:$0xff pattern:$0x73625140]  ;;  %v406_v16 = vld.sshfl [vmem:[#allocation1 + $0x8] sm:$0xff pattern:$0x73625140] }
  0x2b   : > { %v410_v17 = vsel %vm353_vm1, %v405_v15, 0  ;;  %v412_v18 = vsel %vm353_vm1, %v406_v16, 0  ;;  %1082 = vst [vmem:[#allocation1] ss:$2 sm:$0xff] %v1659_v4 }
  0x2c   : > { %421 = vmatpush.bf16.msra.mxu2 %v410_v17  ;;  %435 = vmatpush.bf16.msra.mxu3 %v412_v18 }
  0x2f   : > { %1341 = vmatmul.msk.bf16.vlgmr.msra.gmra.mxu2 %vm349_vm2, %v1340_v19  ;;  %1342 = vmatmul.msk.bf16.vlgmr.msra.gmra.mxu3 %vm349_vm2, %v1340_v19 }
  0x88   : > { %v391_v20 = vpop.permute.xlu0 %390 }
  0x90   : > { %v343_v21 = vpop.permute.xlu0 %342 }
  0xa4   : > { %v367_v22 = vpop.f32.mrf.mxu0  ;;  %v380_v23 = vpop.f32.mrf.mxu1 }
  0xa5   : > { %v368_v24 = vadd.f32 %v367_v22, %v343_v21  ;;  %v381_v25 = vadd.f32 %v380_v23, %v343_v21 }
  0xa7   : > { %v442_v26 = vpack.c.bf16 %v368_v24, %v368_v24  ;;  %v443_v27 = vpack.c.bf16 %v381_v25, %v381_v25 }
  0xa9   : > { %v523_v28 = vsel %vm521_vm3, %v442_v26, 0  ;;  %v526_v29 = vsel %vm521_vm3, %v443_v27, 0 }
  0xaa   : > { %535 = vmatpush.bf16.msrb.mxu0 %v523_v28  ;;  %1384 = vmatpush.bf16.msrb.mxu2 %v523_v28 }
  0xab   : > { %624 = vmatpush.bf16.msrb.mxu1 %v526_v29  ;;  %1385 = vmatpush.bf16.msrb.mxu3 %v526_v29 }
  0xac   : > { %v382_v30 = vpop.f32.mrf.mxu1  ;;  %v369_v31 = vpop.f32.mrf.mxu0 }
  0xb2   : > { %v423_v32 = vpop.f32.mrf.mxu2  ;;  %v437_v33 = vpop.f32.mrf.mxu3 }
  0xb3   : > { %v424_v34 = vadd.f32 %v423_v32, %v391_v20  ;;  %v438_v35 = vadd.f32 %v437_v33, %v391_v20 }
  0xb5   : > { %v444_v36 = vpack.c.bf16 %v424_v34, %v424_v34  ;;  %v445_v37 = vpack.c.bf16 %v438_v35, %v438_v35 }
  0xb7   : > { %448 = vxpose.binary.xlu1.c.b16.start.end [1/2] (short) %v445_v37, %v444_v36, 128 }
  0xba   : > { %v1845_v4 = vpop.f32.mrf.mxu2  ;;  %v1847_v5 = vpop.f32.mrf.mxu3 }
  0xbb   : > { %2485 = vst [vmem:[#allocation10_spill] sm:$0xff] %v1845_v4 }
  0xbc   : > { %2486 = vst [vmem:[#allocation11_spill] sm:$0xff] %v1847_v5 }
 0x10a   : > { %1445 = vset.pattern.permute.xlu1 %v1658_v3 }
 0x163   : > { %v456_v38 = vpop.trf.xlu1 }
 0x164   : > { %1343 = vmatmul.msk.bf16.vlgmr.msrb.gmra.mxu0 %vm472_vm4, %v456_v38  ;;  %1359 = vmatmul.msk.bf16.vlgmr.msrb.gmra.mxu1 %vm472_vm4, %v456_v38 }
 0x16b   : > { %v457_v39 = vpop.trf.xlu1 }
 0x173   : > { %v458_v40 = vpop.trf.xlu1 }
 0x174   : > { %1344 = vmatmul.msk.bf16.gmra.mxu0 %vm472_vm4, %v458_v40  ;;  %1360 = vmatmul.msk.bf16.gmra.mxu1 %vm472_vm4, %v458_v40 }
 0x17b   : > { %v459_v41 = vpop.trf.xlu1 }
 0x181   : > { %395 = vperm.xlu1 %1445, %v387_v42  }
 0x183   : > { %v460_v43 = vpop.trf.xlu1 }
 0x184   : > { %1345 = vmatmul.msk.bf16.gmra.mxu0 %vm472_vm4, %v460_v43  ;;  %1361 = vmatmul.msk.bf16.gmra.mxu1 %vm472_vm4, %v460_v43 }
 0x18b   : > { %v461_v44 = vpop.trf.xlu1 }
 0x18c   : > { %1353 = vmatmul.msk.bf16.vlgmr.msrb.gmra.mxu2 %vm472_vm4, %v461_v44  ;;  %1369 = vmatmul.msk.bf16.vlgmr.msrb.gmra.mxu3 %vm472_vm4, %v461_v44 }
 0x193   : > { %v462_v45 = vpop.trf.xlu1 }
 0x194   : > { %1346 = vmatmul.msk.bf16.gmra.mxu0 %vm472_vm4, %v462_v45  ;;  %1362 = vmatmul.msk.bf16.gmra.mxu1 %vm472_vm4, %v462_v45 }
 0x19b   : > { %v463_v46 = vpop.trf.xlu1 }
 0x19c   : > { %1354 = vmatmul.msk.bf16.gmra.mxu2 %vm472_vm4, %v463_v46  ;;  %1370 = vmatmul.msk.bf16.gmra.mxu3 %vm472_vm4, %v463_v46 }
 0x1a3   : > { %v464_v47 = vpop.trf.xlu1 }
 0x1a4   : > { %1347 = vmatmul.msk.bf16.gmra.mxu0 %vm472_vm4, %v464_v47  ;;  %1363 = vmatmul.msk.bf16.gmra.mxu1 %vm472_vm4, %v464_v47 }
 0x1ab   : > { %v465_v48 = vpop.trf.xlu1 }
 0x1ac   : > { %1355 = vmatmul.msk.bf16.gmra.mxu2 %vm472_vm4, %v465_v48  ;;  %1371 = vmatmul.msk.bf16.gmra.mxu3 %vm472_vm4, %v465_v48 }
 0x1b3   : > { %v466_v49 = vpop.trf.xlu1 }
 0x1b4   : > { %1348 = vmatmul.msk.bf16.gmra.mxu0 %vm472_vm4, %v466_v49  ;;  %1364 = vmatmul.msk.bf16.gmra.mxu1 %vm472_vm4, %v466_v49 }
 0x1bb   : > { %v467_v50 = vpop.trf.xlu1 }
 0x1bc   : > { %1356 = vmatmul.msk.bf16.gmra.mxu2 %vm472_vm4, %v467_v50  ;;  %1372 = vmatmul.msk.bf16.gmra.mxu3 %vm472_vm4, %v467_v50 }
 0x1c3   : > { %v468_v51 = vpop.trf.xlu1 }
 0x1c4   : > { %1349 = vmatmul.msk.bf16.gmra.mxu0 %vm472_vm4, %v468_v51  ;;  %1365 = vmatmul.msk.bf16.gmra.mxu1 %vm472_vm4, %v468_v51 }
 0x1cb   : > { %v469_v52 = vpop.trf.xlu1 }
 0x1cc   : > { %1357 = vmatmul.msk.bf16.gmra.mxu2 %vm472_vm4, %v469_v52  ;;  %1373 = vmatmul.msk.bf16.gmra.mxu3 %vm472_vm4, %v469_v52 }
 0x1d3   : > { %v470_v53 = vpop.trf.xlu1 }
 0x1d4   : > { %1350 = vmatmul.msk.bf16.gmra.mxu0 %vm472_vm4, %v470_v53  ;;  %1366 = vmatmul.msk.bf16.gmra.mxu1 %vm472_vm4, %v470_v53 }
 0x1db   : > { %v471_v54 = vpop.trf.xlu1 }
 0x1dc   : > { %1358 = vmatmul.msk.bf16.gmra.mxu2 %vm472_vm4, %v471_v54  ;;  %1374 = vmatmul.msk.bf16.gmra.mxu3 %vm472_vm4, %v471_v54 }
 0x1e1   : > { %v1817_v55 = vpop.f32.mrf.mxu0  ;;  %v1819_v56 = vpop.f32.mrf.mxu1 }
 0x1e4   : > { %1351 = vmatmul.msk.bf16.gmra.mxu0 %vm472_vm4, %v457_v39  ;;  %1367 = vmatmul.msk.bf16.gmra.mxu1 %vm472_vm4, %v457_v39 }
 0x1e9   : > { %v1823_v57 = vpop.f32.mrf.mxu0  ;;  %v1825_v58 = vpop.f32.mrf.mxu1 }
 0x1f1   : > { %v1827_v59 = vpop.f32.mrf.mxu0  ;;  %v1829_v60 = vpop.f32.mrf.mxu1 }
 0x1f2   : > { %v707_v44 = vmax.f32 %v1817_v55, %v1827_v59  ;;  %v744_v45 = vmax.f32 %v1819_v56, %v1829_v60 }
 0x1f4   : > { %1352 = vmatmul.msk.bf16.gmra.mxu0 %vm472_vm4, %v459_v41  ;;  %1368 = vmatmul.msk.bf16.gmra.mxu1 %vm472_vm4, %v459_v41 }
 0x1f9   : > { %v1833_v61 = vpop.f32.mrf.mxu0  ;;  %v1835_v62 = vpop.f32.mrf.mxu1 }
 0x1fa   : > { %v708_v54 = vmax.f32 %v1823_v57, %v1833_v61 }
 0x201   : > { %v1837_v63 = vpop.f32.mrf.mxu0  ;;  %v1839_v0 = vpop.f32.mrf.mxu1 }
 0x202   : > { %2484 = vst [vmem:[#allocation9_spill] sm:$0xff] %v1839_v0  ;;  %v709_v46 = vmax.f32 %v707_v44, %v1837_v63  ;;  %v746_v47 = vmax.f32 %v744_v45, %v1839_v0  ;;  %v745_v45 = vmax.f32 %v1825_v58, %v1835_v62 }
 0x209   : > { %v1841_v1 = vpop.f32.mrf.mxu0  ;;  %v1843_v3 = vpop.f32.mrf.mxu1 }
 0x20f   : > { %v1853_v8 = vpop.f32.mrf.mxu2  ;;  %v1855_v9 = vpop.f32.mrf.mxu3 }
 0x211   : > { %v1849_v6 = vpop.f32.mrf.mxu0  ;;  %v1851_v7 = vpop.f32.mrf.mxu1 }
 0x212   : > { %2487 = vst [vmem:[#allocation12_spill] sm:$0xff] %v1849_v6  ;;  %v711_v48 = vmax.f32 %v709_v46, %v1849_v6  ;;  %v748_v49 = vmax.f32 %v746_v47, %v1851_v7 }
 0x213   : > { %2488 = vst [vmem:[#allocation13_spill] sm:$0xff] %v1851_v7 }
 0x217   : > { %v1865_v14 = vpop.f32.mrf.mxu2  ;;  %v1867_v15 = vpop.f32.mrf.mxu3 }
 0x219   : > { %v1857_v10 = vpop.f32.mrf.mxu0  ;;  %v1859_v11 = vpop.f32.mrf.mxu1 }
 0x21f   : > { %v1873_v18 = vpop.f32.mrf.mxu2  ;;  %v1875_v19 = vpop.f32.mrf.mxu3 }
 0x220   : > { %2491 = vst [vmem:[#allocation16_spill] sm:$0xff] %v1875_v19 }
 0x221   : > { %v1861_v12 = vpop.f32.mrf.mxu0  ;;  %v1863_v13 = vpop.f32.mrf.mxu1 }
 0x222   : > { %2489 = vst [vmem:[#allocation14_spill] sm:$0xff] %v1861_v12  ;;  %v713_v50 = vmax.f32 %v711_v48, %v1861_v12  ;;  %v750_v51 = vmax.f32 %v748_v49, %v1863_v13  ;;  %v710_v48 = vmax.f32 %v708_v54, %v1841_v1  ;;  %v747_v49 = vmax.f32 %v745_v45, %v1843_v3 }
 0x223   : > { %2490 = vst [vmem:[#allocation15_spill] sm:$0xff] %v1863_v13 }
 0x224   : > { %v712_v7 = vmax.f32 %v710_v48, %v1857_v10  ;;  %v749_v12 = vmax.f32 %v747_v49, %v1859_v11 }
 0x227   : > { %v1881_v22 = vpop.f32.mrf.mxu2  ;;  %v1883_v23 = vpop.f32.mrf.mxu3 }
 0x228   : > { %2493 = vst [vmem:[#allocation18_spill] sm:$0xff] %v1883_v23 }
 0x229   : > { %v1869_v16 = vpop.f32.mrf.mxu0  ;;  %v1871_v17 = vpop.f32.mrf.mxu1 }
 0x22f   : > { %v1889_v26 = vpop.f32.mrf.mxu2  ;;  %v1891_v27 = vpop.f32.mrf.mxu3 }
 0x230   : > { %2495 = vst [vmem:[#allocation20_spill] sm:$0xff] %v1889_v26 }
 0x231   : > { %v1877_v20 = vpop.f32.mrf.mxu0  ;;  %v1879_v21 = vpop.f32.mrf.mxu1  ;;  %2496 = vst [vmem:[#allocation21_spill] sm:$0xff] %v1891_v27 }
 0x232   : > { %2492 = vst [vmem:[#allocation17_spill] sm:$0xff] %v1879_v21  ;;  %v715_v46 = vmax.f32 %v713_v50, %v1877_v20  ;;  %v752_v47 = vmax.f32 %v750_v51, %v1879_v21  ;;  %v714_v50 = vmax.f32 %v712_v7, %v1869_v16  ;;  %v751_v51 = vmax.f32 %v749_v12, %v1871_v17 }
 0x237   : > { %v1901_v32 = vpop.f32.mrf.mxu2  ;;  %v1903_v33 = vpop.f32.mrf.mxu3 }
 0x238   : > { %2498 = vst [vmem:[#allocation23_spill] sm:$0xff] %v1901_v32 }
 0x239   : > { %v1885_v24 = vpop.f32.mrf.mxu0  ;;  %v1887_v25 = vpop.f32.mrf.mxu1  ;;  %2499 = vst [vmem:[#allocation24_spill] sm:$0xff] %v1903_v33 }
 0x23a   : > { %2494 = vst [vmem:[#allocation19_spill] sm:$0xff] %v1887_v25 }
 0x23f   : > { %v1909_v36 = vpop.f32.mrf.mxu2  ;;  %v1911_v37 = vpop.f32.mrf.mxu3 }
 0x240   : > { %2501 = vst [vmem:[#allocation26_spill] sm:$0xff] %v1909_v36 }
 0x241   : > { %v1893_v28 = vpop.f32.mrf.mxu0  ;;  %v1895_v29 = vpop.f32.mrf.mxu1  ;;  %2502 = vst [vmem:[#allocation27_spill] sm:$0xff] %v1911_v37 }
 0x242   : > { %2497 = vst [vmem:[#allocation22_spill] sm:$0xff] %v1895_v29  ;;  %v717_v4 = vmax.f32 %v715_v46, %v1893_v28  ;;  %v754_v13 = vmax.f32 %v752_v47, %v1895_v29  ;;  %v1660_v47 = vmov -inf  }
 0x243   : > { %333 = vst.msk [vmem:[#allocation2] sm:$0x3] %vm1756_vm0, %v1660_v47 }
 0x247   : > { %v1917_v40 = vpop.f32.mrf.mxu2  ;;  %v1919_v41 = vpop.f32.mrf.mxu3 }
 0x248   : > { %2503 = vst [vmem:[#allocation28_spill] sm:$0xff] %v1917_v40 }
 0x249   : > { %v1897_v30 = vpop.f32.mrf.mxu0  ;;  %v1899_v31 = vpop.f32.mrf.mxu1  ;;  %2504 = vst [vmem:[#allocation29_spill] sm:$0xff] %v1919_v41 }
 0x24f   : > { %v1935_v52 = vpop.f32.mrf.mxu2  ;;  %v1937_v53 = vpop.f32.mrf.mxu3 }
 0x250   : > { %2506 = vst [vmem:[#allocation31_spill] sm:$0xff] %v1937_v53 }
 0x251   : > { %v1905_v34 = vpop.f32.mrf.mxu0  ;;  %v1907_v35 = vpop.f32.mrf.mxu1 }
 0x252   : > { %2500 = vst [vmem:[#allocation25_spill] sm:$0xff] %v1907_v35  ;;  %v719_v6 = vmax.f32 %v717_v4, %v1905_v34  ;;  %v756_v0 = vmax.f32 %v754_v13, %v1907_v35  ;;  %v716_v4 = vmax.f32 %v714_v50, %v1885_v24  ;;  %v753_v13 = vmax.f32 %v751_v51, %v1887_v25 }
 0x254   : > { %v755_v49 = vmax.f32 %v753_v13, %v1899_v31 }
 0x257   : > { %v1971_v48 = vpop.f32.mrf.mxu2 }
 0x259   : > { %v1913_v38 = vpop.f32.mrf.mxu0  ;;  %v1915_v39 = vpop.f32.mrf.mxu1 }
 0x25a   : > { %v757_v51 = vmax.f32 %v755_v49, %v1915_v39 }
 0x25f   : > { %v1993_v49 = vpop.f32.mrf.mxu2 }
 0x261   : > { %v1921_v42 = vpop.f32.mrf.mxu0  ;;  %v1923_v43 = vpop.f32.mrf.mxu1 }
 0x262   : > { %2505 = vst [vmem:[#allocation30_spill] sm:$0xff] %v1921_v42  ;;  %v721_v54 = vmax.f32 %v719_v6, %v1921_v42  ;;  %v758_v45 = vmax.f32 %v756_v0, %v1923_v43  ;;  %v1973_v6 = vpop.f32.mrf.mxu3  ;;  %v718_v0 = vmax.f32 %v716_v4, %v1897_v30 }
 0x263   : > { %2507 = vst [vmem:[#allocation32_spill] sm:$0xff] %v1973_v6 }
 0x264   : > { %v720_v50 = vmax.f32 %v718_v0, %v1913_v38 }
 0x269   : > { %v1941_v5 = vpop.f32.mrf.mxu0  ;;  %v1943_v44 = vpop.f32.mrf.mxu1 }
 0x26a   : > { %v722_v35 = vmax.f32 %v720_v50, %v1941_v5  ;;  %v759_v29 = vmax.f32 %v757_v51, %v1943_v44 }
 0x271   : > { %v1961_v21 = vpop.f32.mrf.mxu0  ;;  %v1963_v46 = vpop.f32.mrf.mxu1 }
 0x272   : > { %v723_v7 = vmax.f32 %v721_v54, %v1961_v21  ;;  %v760_v12 = vmax.f32 %v758_v45, %v1963_v46 }
 0x274   : > { %v725_v42 = vmax.f32 %v723_v7, %v1853_v8  ;;  %v762_v47 = vmax.f32 %v760_v12, %v1855_v9 }
 0x276   : > { %v727_v54 = vmax.f32 %v725_v42, %v1873_v18  ;;  %v764_v45 = vmax.f32 %v762_v47, %v1875_v19  ;;  %v1995_v42 = vpop.f32.mrf.mxu3 }
 0x278   : > { %v729_v13 = vmax.f32 %v727_v54, %v1889_v26  ;;  %v766_v7 = vmax.f32 %v764_v45, %v1891_v27 }
 0x279   : > { %v1985_v25 = vpop.f32.mrf.mxu0  ;;  %v1987_v4 = vpop.f32.mrf.mxu1 }
 0x27a   : > { %v724_v12 = vmax.f32 %v722_v35, %v1985_v25  ;;  %v761_v0 = vmax.f32 %v759_v29, %v1987_v4  ;;  %v731_v51 = vmax.f32 %v729_v13, %v1909_v36  ;;  %v768_v19 = vmax.f32 %v766_v7, %v1911_v37  ;;  %v2011_v37 = vpop.f32.mrf.mxu2 }
 0x27c   : > { %v726_v47 = vmax.f32 %v724_v12, %v1865_v14  ;;  %v763_v50 = vmax.f32 %v761_v0, %v1867_v15  ;;  %v733_v27 = vmax.f32 %v731_v51, %v1935_v52  ;;  %v770_v26 = vmax.f32 %v768_v19, %v1937_v53 }
 0x27e   : > { %v728_v54 = vmax.f32 %v726_v47, %v1881_v22  ;;  %v765_v45 = vmax.f32 %v763_v50, %v1883_v23  ;;  %v2013_v47 = vpop.f32.mrf.mxu3  ;;  %v735_v50 = vmax.f32 %v733_v27, %v1993_v49 }
 0x280   : > { %v730_v35 = vmax.f32 %v728_v54, %v1901_v32  ;;  %v767_v29 = vmax.f32 %v765_v45, %v1903_v33  ;;  %v772_v54 = vmax.f32 %v770_v26, %v1995_v42  ;;  %v2019_v26 = vld [vmem:[#allocation2] sm:$0x3] }
 0x281   : > { %2508 = vst [vmem:[#allocation33_spill] sm:$0xff] %v2019_v26 }
 0x282   : > { %v732_v12 = vmax.f32 %v730_v35, %v1917_v40  ;;  %v769_v0 = vmax.f32 %v767_v29, %v1919_v41 }
 0x284   : > { %v734_v13 = vmax.f32 %v732_v12, %v1971_v48  ;;  %v771_v7 = vmax.f32 %v769_v0, %v1973_v6 }
 0x286   : > { %v736_v51 = vmax.f32 %v734_v13, %v2011_v37  ;;  %v773_v19 = vmax.f32 %v771_v7, %v2013_v47 }
 0x288   : > { %v737_v45 = vmax.f32 %v735_v50, %v736_v51  ;;  %v774_v35 = vmax.f32 %v772_v54, %v773_v19 }
 0x28a   : > { %v738_v53 = vrot.slane %v737_v45, 4  ;;  %v775_v29 = vrot.slane %v774_v35, 4 }
 0x28c   : > { %v739_v41 = vmax.f32 %v737_v45, %v738_v53  ;;  %v776_v12 = vmax.f32 %v774_v35, %v775_v29 }
 0x28e   : > { %v740_v33 = vrot.slane %v739_v41, 2  ;;  %v777_v0 = vrot.slane %v776_v12, 2 }
 0x290   : > { %v741_v6 = vmax.f32 %v739_v41, %v740_v33  ;;  %v778_v23 = vmax.f32 %v776_v12, %v777_v0 }
 0x292   : > { %v742_v32 = vrot.slane %v741_v6, 1  ;;  %v779_v40 = vrot.slane %v778_v23, 1 }
 0x294   : > { %v780_v36 = vmax.f32 %v778_v23, %v779_v40  ;;  %v743_v27 = vmax.f32 %v741_v6, %v742_v32 }
 0x296   : > { %v783_v13 = vrot.slane %v780_v36, 7 }
 0x298   : > { %v785_v7 = vsel %vm784_vm5, %v743_v27, %v783_v13  ;;  %v2511_v27 = vld [vmem:[#allocation12_spill] sm:$0xff] }
 0x299   : > { %v2023_v50 = vmax.f32 %v2019_v26, %v785_v7 }
 0x29b   : > { %2509 = vst [vmem:[#allocation34_spill] sm:$0xff] %v2023_v50  ;;  %v2031_v33 = vperm.slane %v2023_v50, 0  ;;  %v2034_v23 = vperm.slane %v2023_v50, 1 }
 0x29c   : > { %1181 = vst.msk [vmem:[#allocation2] sm:$0x3] %vm1756_vm0, %v2023_v50 }
 0x29d   : > { %v796_v32 = vsub.f32 %v1817_v55, %v2031_v33  ;;  %v797_v36 = vsub.f32 %v1819_v56, %v2034_v23  ;;  %v798_v40 = vsub.f32 %v1823_v57, %v2031_v33  ;;  %v799_v41 = vsub.f32 %v1825_v58, %v2034_v23 }
 0x29e   : > { %v800_v6 = vsub.f32 %v1827_v59, %v2031_v33  ;;  %v801_v51 = vsub.f32 %v1829_v60, %v2034_v23  ;;  %v802_v55 = vsub.f32 %v1833_v61, %v2031_v33  ;;  %v803_v56 = vsub.f32 %v1835_v62, %v2034_v23  ;;  %v2510_v59 = vld [vmem:[#allocation9_spill] sm:$0xff] }
 0x29f   : > { %v860_v54 = vmul.f32 1.442695, %v796_v32  ;;  %v862_v19 = vmul.f32 1.442695, %v797_v36  ;;  %v864_v45 = vmul.f32 1.442695, %v798_v40  ;;  %v804_v57 = vsub.f32 %v1837_v63, %v2031_v33 }
 0x2a0   : > { %v866_v35 = vmul.f32 1.442695, %v799_v41  ;;  %v868_v58 = vmul.f32 1.442695, %v800_v6  ;;  %v805_v29 = vsub.f32 %v2510_v59, %v2034_v23  ;;  %v870_v12 = vmul.f32 1.442695, %v801_v51 }
 0x2a1   : > { %1446 = vpow2.f32 %v860_v54  ;;  %v806_v60 = vsub.f32 %v1841_v1, %v2031_v33  ;;  %v872_v61 = vmul.f32 1.442695, %v802_v55  ;;  %v807_v0 = vsub.f32 %v1843_v3, %v2034_v23  ;;  %v2512_v1 = vld [vmem:[#allocation14_spill] sm:$0xff] }
 0x2a2   : > { %1448 = vpow2.f32 %v862_v19  ;;  %v874_v62 = vmul.f32 1.442695, %v803_v56  ;;  %v808_v63 = vsub.f32 %v2511_v27, %v2031_v33  ;;  %v876_v13 = vmul.f32 1.442695, %v804_v57 }
 0x2a3   : > { %1450 = vpow2.f32 %v864_v45  ;;  %v810_v7 = vsub.f32 %v1857_v10, %v2031_v33  ;;  %v878_v32 = vmul.f32 1.442695, %v805_v29  ;;  %v812_v40 = vsub.f32 %v2512_v1, %v2031_v33 }
 0x2a4   : > { %1452 = vpow2.f32 %v866_v35  ;;  %v880_v41 = vmul.f32 1.442695, %v806_v60  ;;  %v816_v6 = vsub.f32 %v1877_v20, %v2031_v33  ;;  %v882_v54 = vmul.f32 1.442695, %v807_v0 }
 0x2a5   : > { %1454 = vpow2.f32 %v868_v58  ;;  %v824_v10 = vsub.f32 %v1905_v34, %v2031_v33  ;;  %v884_v19 = vmul.f32 1.442695, %v808_v63  ;;  %v826_v45 = vsub.f32 %v1913_v38, %v2031_v33 }
 0x2a6   : > { %1456 = vpow2.f32 %v870_v12  ;;  %v888_v56 = vmul.f32 1.442695, %v810_v7  ;;  %v818_v20 = vsub.f32 %v1885_v24, %v2031_v33  ;;  %v892_v57 = vmul.f32 1.442695, %v812_v40 }
 0x2a7   : > { %v2064_v36 = vpop.eup %1446  ;;  %1458 = vpow2.f32 %v872_v61  ;;  %v820_v34 = vsub.f32 %v1893_v28, %v2031_v33  ;;  %v900_v59 = vmul.f32 1.442695, %v816_v6  ;;  %v822_v38 = vsub.f32 %v1897_v30, %v2031_v33 }
 0x2a8   : > { %v2068_v3 = vpop.eup %1448  ;;  %1460 = vpow2.f32 %v874_v62  ;;  %v916_v12 = vmul.f32 1.442695, %v824_v10  ;;  %v829_v24 = vsub.f32 %v1923_v43, %v2034_v23  ;;  %v920_v61 = vmul.f32 1.442695, %v826_v45 }
 0x2a9   : > { %v2072_v51 = vpop.eup %1450  ;;  %1462 = vpow2.f32 %v876_v13  ;;  %v831_v28 = vsub.f32 %v1943_v44, %v2034_v23  ;;  %v904_v62 = vmul.f32 1.442695, %v818_v20  ;;  %v832_v30 = vsub.f32 %v1961_v21, %v2031_v33 }
 0x2aa   : > { %v2076_v55 = vpop.eup %1452  ;;  %1464 = vpow2.f32 %v878_v32  ;;  %v908_v63 = vmul.f32 1.442695, %v820_v34  ;;  %v833_v43 = vsub.f32 %v1963_v46, %v2034_v23  ;;  %v912_v7 = vmul.f32 1.442695, %v822_v38 }
 0x2ab   : > { %2513 = vst [vmem:[#allocation9_spill] sm:$0xff] %v2076_v55  ;;  %v2080_v35 = vpop.eup %1454  ;;  %1466 = vpow2.f32 %v880_v41  ;;  %v834_v44 = vsub.f32 %v1985_v25, %v2031_v33  ;;  %v926_v1 = vmul.f32 1.442695, %v829_v24  ;;  %v835_v21 = vsub.f32 %v1987_v4, %v2034_v23 }
 0x2ac   : > { %v2084_v58 = vpop.eup %1456  ;;  %1468 = vpow2.f32 %v882_v54  ;;  %v930_v41 = vmul.f32 1.442695, %v831_v28  ;;  %v990_v6 = vadd.f32 %v2072_v51, %v2064_v36  ;;  %v814_v54 = vsub.f32 %v1869_v16, %v2031_v33 }
 0x2ad   : > { %v2088_v29 = vpop.eup %1458  ;;  %1470 = vpow2.f32 %v884_v19  ;;  %v932_v10 = vmul.f32 1.442695, %v832_v30  ;;  %v2514_v19 = vld [vmem:[#allocation13_spill] sm:$0xff]  ;;  %v811_v16 = vsub.f32 %v1859_v11, %v2034_v23  ;;  %v938_v38 = vmul.f32 1.442695, %v835_v21  ;;  %v2517_v11 = vld [vmem:[#allocation10_spill] sm:$0xff] }
 0x2ae   : > { %v2092_v60 = vpop.eup %1460  ;;  %1472 = vpow2.f32 %v888_v56  ;;  %v809_v45 = vsub.f32 %v2514_v19, %v2034_v23  ;;  %v934_v56 = vmul.f32 1.442695, %v833_v43  ;;  %v991_v4 = vadd.f32 %v2080_v35, %v990_v6 }
 0x2af   : > { %v2096_v0 = vpop.eup %1462  ;;  %1474 = vpow2.f32 %v892_v57  ;;  %v936_v57 = vmul.f32 1.442695, %v834_v44  ;;  %v815_v6 = vsub.f32 %v1871_v17, %v2034_v23 }
 0x2b0   : > { %v2100_v27 = vpop.eup %1464  ;;  %1476 = vpow2.f32 %v900_v59  ;;  %v2131_v59 = vpop.permute.xlu1 %395 }
 0x2b1   : > { %v2104_v13 = vpop.eup %1466  ;;  %1478 = vpow2.f32 %v916_v12  ;;  %2515 = vst [vmem:[#allocation12_spill] sm:$0xff] %v2131_v59  ;;  %v992_v12 = vadd.f32 %v2088_v29, %v991_v4  ;;  %v426_v44 = vadd.f32 %v2517_v11, %v2131_v59  ;;  %v2518_v4 = vld [vmem:[#allocation17_spill] sm:$0xff]  ;;  %v2519_v11 = vld [vmem:[#allocation19_spill] sm:$0xff] }
 0x2b2   : > { %v2108_v32 = vpop.eup %1468  ;;  %1480 = vpow2.f32 %v920_v61  ;;  %v896_v61 = vmul.f32 1.442695, %v814_v54  ;;  %v890_v54 = vmul.f32 1.442695, %v811_v16 }
 0x2b3   : > { %v2112_v40 = vpop.eup %1470  ;;  %1482 = vpow2.f32 %v904_v62  ;;  %v2516_v62 = vld [vmem:[#allocation15_spill] sm:$0xff]  ;;  %v993_v43 = vadd.f32 %v2096_v0, %v992_v12  ;;  %v2166_v16 = vpack.c.bf16 %v426_v44, %v426_v44 }
 0x2b4   : > { %v2118_v46 = vpop.eup %1472  ;;  %1484 = vpow2.f32 %v908_v63  ;;  %v813_v30 = vsub.f32 %v2516_v62, %v2034_v23  ;;  %v886_v63 = vmul.f32 1.442695, %v809_v45 }
 0x2b5   : > { %v2122_v25 = vpop.eup %1474  ;;  %1486 = vpow2.f32 %v912_v7 }
 0x2b6   : > { %v2127_v20 = vpop.eup %1476  ;;  %1488 = vpow2.f32 %v926_v1  ;;  %v1027_v1 = vadd.f32 %v2076_v55, %v2068_v3  ;;  %v894_v12 = vmul.f32 1.442695, %v813_v30 }
 0x2b7   : > { %v2129_v34 = vpop.eup %1478  ;;  %1490 = vpow2.f32 %v930_v41 }
 0x2b8   : > { %v2136_v24 = vpop.eup %1480  ;;  %1492 = vpow2.f32 %v932_v10  ;;  %v994_v10 = vadd.f32 %v2104_v13, %v993_v43  ;;  %v1028_v45 = vadd.f32 %v2084_v58, %v1027_v1  ;;  %v819_v1 = vsub.f32 %v2519_v11, %v2034_v23 }
 0x2b9   : > { %v2138_v28 = vpop.eup %1482  ;;  %1494 = vpow2.f32 %v934_v56  ;;  %v1103_v21 = vpack.c.bf16 %v2136_v24, %v2129_v34 }
 0x2ba   : > { %v2143_v7 = vpop.eup %1484  ;;  %1496 = vpow2.f32 %v936_v57  ;;  %v817_v57 = vsub.f32 %v2518_v4, %v2034_v23  ;;  %v995_v62 = vadd.f32 %v2112_v40, %v994_v10  ;;  %v2520_v10 = vld [vmem:[#allocation22_spill] sm:$0xff]  ;;  %v2521_v4 = vld [vmem:[#allocation25_spill] sm:$0xff] }
 0x2bb   : > { %v2151_v41 = vpop.eup %1486  ;;  %1498 = vpow2.f32 %v938_v38  ;;  %1121 = vmatpush.bf16.msra.mxu2 %v1103_v21  ;;  %v1029_v38 = vadd.f32 %v2092_v60, %v1028_v45  ;;  %v898_v21 = vmul.f32 1.442695, %v815_v6  ;;  %v821_v44 = vsub.f32 %v2520_v10, %v2034_v23  ;;  %v2522_v10 = vld [vmem:[#allocation30_spill] sm:$0xff] }
 0x2bc   : > { %v2156_v19 = vpop.eup %1488  ;;  %1500 = vpow2.f32 %v896_v61  ;;  %v1101_v61 = vpack.c.bf16 %v2151_v41, %v2143_v7  ;;  %v996_v30 = vadd.f32 %v2118_v46, %v995_v62  ;;  %v823_v45 = vsub.f32 %v1899_v31, %v2034_v23 }
 0x2bd   : > { %v2159_v56 = vpop.eup %1490  ;;  %1502 = vpow2.f32 %v886_v63  ;;  %v825_v53 = vsub.f32 %v2521_v4, %v2034_v23  ;;  %v1030_v2 = vadd.f32 %v2100_v27, %v1029_v38  ;;  %v902_v6 = vmul.f32 1.442695, %v817_v57 }
 0x2be   : > { %v2164_v17 = vpop.eup %1492  ;;  %1504 = vpow2.f32 %v890_v54  ;;  %v997_v54 = vadd.f32 %v2122_v25, %v996_v30  ;;  %v828_v26 = vsub.f32 %v2522_v10, %v2031_v33  ;;  %v1099_v4 = vpack.c.bf16 %v2138_v28, %v2127_v20 }
 0x2bf   : > { %v2171_v43 = vpop.eup %1494  ;;  %1122 = vmatpush.bf16.msra.mxu2 %v1101_v61  ;;  %1506 = vpow2.f32 %v894_v12  ;;  %v1031_v31 = vadd.f32 %v2108_v32, %v1030_v2  ;;  %v906_v57 = vmul.f32 1.442695, %v819_v1  ;;  %v827_v62 = vsub.f32 %v1915_v39, %v2034_v23 }
 0x2c0   : > { %v2176_v63 = vpop.eup %1496  ;;  %1508 = vpow2.f32 %v898_v21  ;;  %v830_v2 = vsub.f32 %v1941_v5, %v2031_v33  ;;  %v836_v10 = vsub.f32 %v1853_v8, %v2031_v33  ;;  %v837_v1 = vsub.f32 %v1855_v9, %v2034_v23 }
 0x2c1   : > { %v2185_v50 = vpop.eup %1498  ;;  %1510 = vpow2.f32 %v902_v6  ;;  %v910_v21 = vmul.f32 1.442695, %v821_v44  ;;  %v838_v39 = vsub.f32 %v1865_v14, %v2031_v33  ;;  %v924_v30 = vmul.f32 1.442695, %v828_v26 }
 0x2c2   : > { %v1501_v11 = vpop.eup %1500  ;;  %1512 = vpow2.f32 %v906_v57  ;;  %v856_v14 = vsub.f32 %v1993_v49, %v2031_v33  ;;  %v928_v26 = vmul.f32 1.442695, %v830_v2  ;;  %v858_v44 = vsub.f32 %v2011_v37, %v2031_v33 }
 0x2c3   : > { %v2197_v61 = vpop.eup %1502  ;;  %v998_v12 = vadd.f32 %v1501_v11, %v997_v54  ;;  %1123 = vmatpush.bf16.msra.mxu2 %v1099_v4  ;;  %v1097_v8 = vpack.c.bf16 %v1501_v11, %v2122_v25  ;;  %v914_v4 = vmul.f32 1.442695, %v823_v45  ;;  %1514 = vpow2.f32 %v910_v21 }
 0x2c4   : > { %v1032_v59 = vadd.f32 %v2197_v61, %v1031_v31  ;;  %v2208_v38 = vpop.eup %1504  ;;  %v839_v31 = vsub.f32 %v1867_v15, %v2034_v23  ;;  %v918_v11 = vmul.f32 1.442695, %v825_v53  ;;  %1516 = vpow2.f32 %v924_v30 }
 0x2c5   : > { %v999_v54 = vadd.f32 %v2127_v20, %v998_v12  ;;  %v2217_v55 = vpop.eup %1506  ;;  %v840_v20 = vsub.f32 %v1873_v18, %v2031_v33  ;;  %v1095_v49 = vpack.c.bf16 %v2118_v46, %v2112_v40  ;;  %v852_v12 = vsub.f32 %v1935_v52, %v2031_v33 }
 0x2c6   : > { %v1033_v5 = vadd.f32 %v2208_v38, %v1032_v59  ;;  %v2227_v25 = vpop.eup %1508  ;;  %1518 = vpow2.f32 %v914_v4  ;;  %v940_v2 = vmul.f32 1.442695, %v836_v10  ;;  %v854_v53 = vsub.f32 %v1971_v48, %v2031_v33 }
 0x2c7   : > { %v1000_v6 = vadd.f32 %v2138_v28, %v999_v54  ;;  %1124 = vmatpush.bf16.msra.mxu2 %v1097_v8  ;;  %v922_v28 = vmul.f32 1.442695, %v827_v62  ;;  %v2235_v57 = vpop.eup %1510  ;;  %1520 = vpow2.f32 %v928_v26  ;;  %v842_v40 = vsub.f32 %v1881_v22, %v2031_v33  ;;  %v2523_v54 = vld [vmem:[#allocation26_spill] sm:$0xff] }
 0x2c8   : > { %v1034_v59 = vadd.f32 %v2217_v55, %v1033_v5  ;;  %v2243_v30 = vpop.eup %1512  ;;  %1522 = vpow2.f32 %v918_v11  ;;  %v944_v46 = vmul.f32 1.442695, %v838_v39  ;;  %v984_v10 = vmul.f32 1.442695, %v858_v44 }
 0x2c9   : > { %v1001_v45 = vadd.f32 %v2143_v7, %v1000_v6  ;;  %v980_v7 = vmul.f32 1.442695, %v856_v14  ;;  %1524 = vpow2.f32 %v922_v28  ;;  %v1093_v48 = vpack.c.bf16 %v2104_v13, %v2096_v0  ;;  %v2251_v21 = vpop.eup %1514  ;;  %v2525_v13 = vld [vmem:[#allocation20_spill] sm:$0xff] }
 0x2ca   : > { %v1035_v18 = vadd.f32 %v2227_v25, %v1034_v59  ;;  %v848_v5 = vsub.f32 %v2523_v54, %v2031_v33  ;;  %1526 = vpow2.f32 %v940_v2  ;;  %v972_v8 = vmul.f32 1.442695, %v852_v12  ;;  %v2256_v4 = vpop.eup %1516 }
 0x2cb   : > { %v1002_v37 = vadd.f32 %v2151_v41, %v1001_v45  ;;  %1125 = vmatpush.bf16.msra.mxu2 %v1095_v49  ;;  %v976_v6 = vmul.f32 1.442695, %v854_v53  ;;  %1528 = vpow2.f32 %v980_v7  ;;  %v844_v26 = vsub.f32 %v2525_v13, %v2031_v33  ;;  %v2526_v49 = vld [vmem:[#allocation16_spill] sm:$0xff]  ;;  %v2527_v53 = vld [vmem:[#allocation23_spill] sm:$0xff] }
 0x2cc   : > { %v1036_v62 = vadd.f32 %v2235_v57, %v1035_v18  ;;  %v2261_v0 = vpop.eup %1518  ;;  %1530 = vpow2.f32 %v944_v46  ;;  %v948_v59 = vmul.f32 1.442695, %v840_v20  ;;  %v952_v11 = vmul.f32 1.442695, %v842_v40 }
 0x2cd   : > { %v1003_v52 = vadd.f32 %v2129_v34, %v1002_v37  ;;  %v2524_v34 = vld [vmem:[#allocation28_spill] sm:$0xff]  ;;  %1532 = vpow2.f32 %v984_v10  ;;  %v1091_v28 = vpack.c.bf16 %v2088_v29, %v2080_v35  ;;  %v841_v12 = vsub.f32 %v2526_v49, %v2034_v23  ;;  %v2528_v35 = vld [vmem:[#allocation18_spill] sm:$0xff] }
 0x2ce   : > { %v1037_v41 = vadd.f32 %v2243_v30, %v1036_v62  ;;  %v850_v39 = vsub.f32 %v2524_v34, %v2031_v33  ;;  %v964_v2 = vmul.f32 1.442695, %v848_v5  ;;  %1534 = vpow2.f32 %v972_v8  ;;  %v2529_v34 = vld [vmem:[#allocation21_spill] sm:$0xff] }
 0x2cf   : > { %v1004_v22 = vadd.f32 %v2136_v24, %v1003_v52  ;;  %1126 = vmatpush.bf16.msra.mxu2 %v1093_v48  ;;  %v2266_v24 = vpop.eup %1520  ;;  %v846_v7 = vsub.f32 %v2527_v53, %v2031_v33  ;;  %1536 = vpow2.f32 %v976_v6  ;;  %v843_v29 = vsub.f32 %v2528_v35, %v2034_v23 }
 0x2d0   : > { %v1038_v14 = vadd.f32 %v2251_v21, %v1037_v41  ;;  %v1523_v18 = vpop.eup %1522  ;;  %v968_v62 = vmul.f32 1.442695, %v850_v39  ;;  %v942_v52 = vmul.f32 1.442695, %v837_v1  ;;  %1538 = vpow2.f32 %v948_v59 }
 0x2d1   : > { %v1005_v44 = vadd.f32 %v2256_v4, %v1004_v22  ;;  %v1525_v20 = vpop.eup %1524  ;;  %1540 = vpow2.f32 %v952_v11  ;;  %v956_v33 = vmul.f32 1.442695, %v844_v26  ;;  %v1089_v54 = vpack.c.bf16 %v2072_v51, %v2064_v36  ;;  %v2530_v26 = vld [vmem:[#allocation24_spill] sm:$0xff] }
 0x2d2   : > { %v1039_v45 = vadd.f32 %v2261_v0, %v1038_v14  ;;  %v2276_v46 = vpop.eup %1526  ;;  %v946_v8 = vmul.f32 1.442695, %v839_v31  ;;  %1542 = vpow2.f32 %v964_v2  ;;  %v1104_v1 = vpack.c.bf16 %v1525_v20, %v1523_v18 }
 0x2d3   : > { %v1006_v37 = vadd.f32 %v2266_v24, %v1005_v44  ;;  %1127 = vmatpush.bf16.msra.mxu2 %v1091_v28  ;;  %v2284_v41 = vpop.eup %1528  ;;  %v845_v39 = vsub.f32 %v2529_v34, %v2034_v23  ;;  %v960_v6 = vmul.f32 1.442695, %v846_v7  ;;  %1544 = vpow2.f32 %v968_v62 }
 0x2d4   : > { %v1040_v40 = vadd.f32 %v1523_v18, %v1039_v45  ;;  %v2288_v5 = vpop.eup %1530  ;;  %1546 = vpow2.f32 %v942_v52  ;;  %v950_v51 = vmul.f32 1.442695, %v841_v12  ;;  %v847_v59 = vsub.f32 %v2530_v26, %v2034_v23  ;;  %v2531_v12 = vld [vmem:[#allocation27_spill] sm:$0xff] }
 0x2d5   : > { %v1007_v10 = vadd.f32 %v2164_v17, %v1006_v37  ;;  %v2294_v22 = vpop.eup %1532  ;;  %1548 = vpow2.f32 %v956_v33  ;;  %v954_v45 = vmul.f32 1.442695, %v843_v29  ;;  %v1102_v18 = vpack.c.bf16 %v2261_v0, %v2251_v21  ;;  %v2532_v21 = vld [vmem:[#allocation29_spill] sm:$0xff] }
 0x2d6   : > { %v1041_v48 = vadd.f32 %v1525_v20, %v1040_v40  ;;  %v2299_v36 = vpop.eup %1534  ;;  %v1119_v31 = vpack.c.bf16 %v2294_v22, %v2284_v41  ;;  %1550 = vpow2.f32 %v946_v8  ;;  %v849_v2 = vsub.f32 %v2531_v12, %v2034_v23 }
 0x2d7   : > { %v1008_v9 = vadd.f32 %v2176_v63, %v1007_v10  ;;  %1128 = vmatpush.bf16.msra.mxu2 %v1089_v54  ;;  %v2304_v13 = vpop.eup %1536  ;;  %1552 = vpow2.f32 %v960_v6  ;;  %v958_v53 = vmul.f32 1.442695, %v845_v39  ;;  %v851_v0 = vsub.f32 %v2532_v21, %v2034_v23  ;;  %v2533_v54 = vld [vmem:[#allocation31_spill] sm:$0xff] }
 0x2d8   : > { %v1042_v14 = vadd.f32 %v2156_v19, %v1041_v48  ;;  %v2309_v11 = vpop.eup %1538  ;;  %1134 = vmatpush.bf16.msra.mxu3 %v1119_v31  ;;  %1554 = vpow2.f32 %v950_v51  ;;  %v1117_v62 = vpack.c.bf16 %v2304_v13, %v2299_v36  ;;  %v962_v52 = vmul.f32 1.442695, %v847_v59  ;;  %v2534_v51 = vld [vmem:[#allocation32_spill] sm:$0xff] }
 0x2d9   : > { %v1009_v15 = vadd.f32 %v2276_v46, %v1008_v9  ;;  %v2315_v49 = vpop.eup %1540  ;;  %1556 = vpow2.f32 %v954_v45  ;;  %v1100_v33 = vpack.c.bf16 %v2243_v30, %v2235_v57  ;;  %v853_v8 = vsub.f32 %v2533_v54, %v2034_v23 }
 0x2da   : > { %v1043_v44 = vadd.f32 %v2159_v56, %v1042_v14  ;;  %1129 = vmatmul.bf16.vlgmr.msra.gmra.mxu2 %v2166_v16  ;;  %v1543_v20 = vpop.eup %1542  ;;  %1558 = vpow2.f32 %v958_v53  ;;  %v966_v34 = vmul.f32 1.442695, %v849_v2  ;;  %v970_v30 = vmul.f32 1.442695, %v851_v0 }
 0x2db   : > { %1147 = vmatpush.bf16.msrb.mxu2 %v1104_v1  ;;  %v1010_v28 = vadd.f32 %v2288_v5, %v1009_v15  ;;  %v1545_v40 = vpop.eup %1544  ;;  %v855_v15 = vsub.f32 %v2534_v51, %v2034_v23  ;;  %1560 = vpow2.f32 %v962_v52  ;;  %v1098_v59 = vpack.c.bf16 %v2227_v25, %v2217_v55 }
 0x2dc   : > { %v1044_v37 = vadd.f32 %v2171_v43, %v1043_v44  ;;  %v2326_v29 = vpop.eup %1546  ;;  %1135 = vmatpush.bf16.msra.mxu3 %v1117_v62  ;;  %v1115_v6 = vpack.c.bf16 %v1545_v40, %v1543_v20  ;;  %v857_v44 = vsub.f32 %v1995_v42, %v2034_v23  ;;  %v859_v45 = vsub.f32 %v2013_v47, %v2034_v23 }
 0x2dd   : > { %v1011_v7 = vadd.f32 %v2309_v11, %v1010_v28  ;;  %v1549_v48 = vpop.eup %1548  ;;  %1562 = vpow2.f32 %v966_v34  ;;  %v974_v12 = vmul.f32 1.442695, %v853_v8  ;;  %v978_v55 = vmul.f32 1.442695, %v855_v15 }
 0x2de   : > { %v1045_v35 = vadd.f32 %v2185_v50, %v1044_v37  ;;  %v2334_v1 = vpop.eup %1550  ;;  %1564 = vpow2.f32 %v970_v30  ;;  %v1096_v42 = vpack.c.bf16 %v2208_v38, %v2197_v61  ;;  %v982_v47 = vmul.f32 1.442695, %v857_v44  ;;  %v2539_v30 = vld [vmem:[#allocation33_spill] sm:$0xff] }
 0x2df   : > { %1148 = vmatpush.bf16.msrb.mxu2 %v1102_v18  ;;  %v1012_v10 = vadd.f32 %v2315_v49, %v1011_v7  ;;  %v1553_v14 = vpop.eup %1552  ;;  %1566 = vpow2.f32 %v974_v12  ;;  %v1111_v0 = vpack.c.bf16 %v2315_v49, %v2309_v11  ;;  %v1094_v38 = vpack.c.bf16 %v2108_v32, %v2100_v27 }
 0x2e0   : > { %v1046_v9 = vadd.f32 %v2326_v29, %v1045_v35  ;;  %v2339_v57 = vpop.eup %1554  ;;  %1136 = vmatpush.bf16.msra.mxu3 %v1115_v6  ;;  %v1113_v37 = vpack.c.bf16 %v1553_v14, %v1549_v48  ;;  %1568 = vpow2.f32 %v978_v55  ;;  %v1109_v11 = vpack.c.bf16 %v2288_v5, %v2276_v46  ;;  %v2536_v46 = vld [vmem:[#allocation9_spill] sm:$0xff] }
 0x2e1   : > { %v1013_v39 = vadd.f32 %v1549_v48, %v1012_v10  ;;  %v2348_v18 = vpop.eup %1556  ;;  %1570 = vpow2.f32 %v982_v47  ;;  %v1090_v5 = vpack.c.bf16 %v2536_v46, %v2068_v3  ;;  %v988_v55 = vld [vmem:[#allocation3] sm:$0x3] }
 0x2e2   : > { %v1047_v31 = vadd.f32 %v2334_v1, %v1046_v9  ;;  %v2351_v7 = vpop.eup %1558 }
 0x2e3   : > { %1149 = vmatpush.bf16.msrb.mxu2 %v1100_v33  ;;  %v1014_v26 = vadd.f32 %v1553_v14, %v1013_v39  ;;  %v2356_v62 = vpop.eup %1560  ;;  %v2537_v39 = vld [vmem:[#allocation12_spill] sm:$0xff] }
 0x2e4   : > { %v1048_v28 = vadd.f32 %v2339_v57, %v1047_v31  ;;  %1137 = vmatpush.bf16.msra.mxu3 %v1113_v37 }
 0x2e5   : > { %v1015_v2 = vadd.f32 %v1543_v20, %v1014_v26  ;;  %v986_v20 = vmul.f32 1.442695, %v859_v45  ;;  %v2540_v26 = vld [vmem:[#allocation34_spill] sm:$0xff] }
 0x2e6   : > { %v1049_v53 = vadd.f32 %v2348_v18, %v1048_v28 }
 0x2e7   : > { %1150 = vmatpush.bf16.msrb.mxu2 %v1098_v59  ;;  %v1016_v25 = vadd.f32 %v1545_v40, %v1015_v2  ;;  %v1563_v40 = vpop.eup %1562  ;;  %1572 = vpow2.f32 %v986_v20 }
 0x2e8   : > { %v1050_v23 = vadd.f32 %v2351_v7, %v1049_v53  ;;  %1138 = vmatpush.bf16.msra.mxu3 %v1111_v0  ;;  %v1565_v10 = vpop.eup %1564 }
 0x2e9   : > { %v1017_v21 = vadd.f32 %v2299_v36, %v1016_v25  ;;  %v1567_v33 = vpop.eup %1566  ;;  %v1116_v12 = vpack.c.bf16 %v1565_v10, %v1563_v40 }
 0x2ea   : > { %v1051_v35 = vadd.f32 %v2356_v62, %v1050_v23  ;;  %v1569_v27 = vpop.eup %1568 }
 0x2eb   : > { %1151 = vmatpush.bf16.msrb.mxu2 %v1096_v42  ;;  %v1018_v52 = vadd.f32 %v2304_v13, %v1017_v21  ;;  %v1092_v13 = vpack.c.bf16 %v2092_v60, %v2084_v58  ;;  %v1571_v8 = vpop.eup %1570  ;;  %v1105_v58 = vpack.c.bf16 %v2266_v24, %v2256_v4  ;;  %v1118_v45 = vpack.c.bf16 %v1569_v27, %v1567_v33 }
 0x2ec   : > { %v1052_v61 = vadd.f32 %v1563_v40, %v1051_v35  ;;  %1139 = vmatpush.bf16.msra.mxu3 %v1109_v11  ;;  %v1114_v42 = vpack.c.bf16 %v2356_v62, %v2351_v7  ;;  %v1112_v21 = vpack.c.bf16 %v2348_v18, %v2339_v57  ;;  %v1110_v40 = vpack.c.bf16 %v2334_v1, %v2326_v29 }
 0x2ed   : > { %v1019_v36 = vadd.f32 %v2284_v41, %v1018_v52  ;;  %v1573_v34 = vpop.eup %1572  ;;  %v2535_v41 = vpack.c.bf16 %v2176_v63, %v2164_v17  ;;  %v2541_v17 = vsub.f32 %v2539_v30, %v2540_v26  ;;  %v2543_v7 = vpack.c.bf16 %v2185_v50, %v2171_v43 }
 0x2ee   : > { %v1053_v49 = vadd.f32 %v1565_v10, %v1052_v61  ;;  %v1120_v15 = vpack.c.bf16 %v1573_v34, %v1571_v8  ;;  %v2544_v62 = vpack.c.bf16 %v2159_v56, %v2156_v19 }
 0x2ef   : > { %1152 = vmatpush.bf16.msrb.mxu2 %v1094_v38  ;;  %v1020_v48 = vadd.f32 %v2294_v22, %v1019_v36  ;;  %v2538_v22 = vld [vmem:[#allocation11_spill] sm:$0xff]  ;;  %v789_v63 = vmul.f32 1.442695, %v2541_v17 }
 0x2f0   : > { %v1054_v54 = vadd.f32 %v1567_v33, %v1053_v49  ;;  %1140 = vmatpush.bf16.msra.mxu3 %v2535_v41  ;;  %v440_v6 = vadd.f32 %v2538_v22, %v2537_v39 }
 0x2f1   : > { %v1021_v32 = vrot.slane %v1020_v48, 4  ;;  %1574 = vpow2.f32 %v789_v63 }
 0x2f2   : > { %v1055_v9 = vadd.f32 %v1569_v27, %v1054_v54  ;;  %v447_v31 = vpack.c.bf16 %v440_v6, %v440_v6  ;;  %v1083_v54 = vld.sshfl [vmem:[#allocation1] sm:$0xff pattern:$0x75316420] }
 0x2f3   : > { %1153 = vmatpush.bf16.msrb.mxu2 %v1092_v13  ;;  %v1022_v14 = vadd.f32 %v1021_v32, %v1020_v48  ;;  %v1084_v48 = vld.sshfl [vmem:[#allocation1 + $0x8] sm:$0xff pattern:$0x75316420] }
 0x2f4   : > { %v1056_v51 = vadd.f32 %v1571_v8, %v1055_v9  ;;  %1141 = vmatpush.bf16.msra.mxu3 %v1105_v58 }
 0x2f5   : > { %v1023_v59 = vrot.slane %v1022_v14, 2 }
 0x2f6   : > { %v1057_v60 = vadd.f32 %v1573_v34, %v1056_v51 }
 0x2f7   : > { %1154 = vmatpush.bf16.msrb.mxu2 %v1090_v5  ;;  %1142 = vmatmul.bf16.vlgmr.msra.gmra.mxu3 %v447_v31  ;;  %v1024_v28 = vadd.f32 %v1023_v59, %v1022_v14  ;;  %v1575_v53 = vpop.eup %1574 }
 0x2f8   : > { %v1058_v44 = vrot.slane %v1057_v60, 4  ;;  %1160 = vmatpush.bf16.msrb.mxu3 %v1120_v15  ;;  %v989_v23 = vmul.f32 %v1575_v53, %v988_v55  ;;  %v1078_v33 = vperm.slane %v1575_v53, 1  ;;  %v1077_v13 = vperm.slane %v1575_v53, 0 }
 0x2f9   : > { %v1025_v2 = vrot.slane %v1024_v28, 1 }
 0x2fa   : > { %1155 = vmatmul.bf16.vlgmr.msrb.gmra.mxu2 %v2166_v16  ;;  %v1059_v3 = vadd.f32 %v1058_v44, %v1057_v60  ;;  %v1088_v9 = vmul.f32 %v1084_v48, %v1078_v33  ;;  %v1087_v5 = vmul.f32 %v1083_v54, %v1077_v13 }
 0x2fb   : > { %v1026_v47 = vadd.f32 %v1025_v2, %v1024_v28 }
 0x2fc   : > { %v1060_v4 = vrot.slane %v1059_v3, 2  ;;  %1161 = vmatpush.bf16.msrb.mxu3 %v1118_v45 }
 0x2fe   : > { %v1061_v24 = vadd.f32 %v1060_v4, %v1059_v3 }
 0x300   : > { %v1062_v37 = vrot.slane %v1061_v24, 1  ;;  %1162 = vmatpush.bf16.msrb.mxu3 %v1116_v12 }
 0x302   : > { %v1063_v25 = vadd.f32 %v1062_v37, %v1061_v24 }
 0x304   : > { %v1066_v16 = vrot.slane %v1063_v25, 7  ;;  %1163 = vmatpush.bf16.msrb.mxu3 %v1114_v42 }
 0x306   : > { %v1067_v20 = vsel %vm784_vm5, %v1026_v47, %v1066_v16 }
 0x307   : > { %v1069_v0 = vadd.f32 %v1067_v20, %v989_v23 }
 0x308   : > { %1164 = vmatpush.bf16.msrb.mxu3 %v1112_v21 }
 0x309   : > { %1074 = vst.msk [vmem:[#allocation3] sm:$0x3] %vm1756_vm0, %v1069_v0 }
 0x30c   : > { %1165 = vmatpush.bf16.msrb.mxu3 %v1110_v40 }
 0x310   : > { %1166 = vmatpush.bf16.msrb.mxu3 %v2543_v7  ;;  %v1186_v52 = vld [vmem:[#allocation3] sm:$0x3] }
 0x311   : > { %v1189_v38 = vperm.slane %v1186_v52, 1  ;;  %v1188_v1 = vperm.slane %v1186_v52, 0 }
 0x313   : > { %v1190_v29 = vrot.slane %v1189_v38, 4 }
 0x314   : > { %1167 = vmatpush.bf16.msrb.mxu3 %v2544_v62 }
 0x315   : > { %v1191_v36 = vsel %vm521_vm3, %v1188_v1, %v1190_v29 }
 0x316   : > { %1576 = vrcp.f32 %v1191_v36  ;;  %v1204_v41 = vand.u32 2147483648, %v1191_v36  ;;  %vm1198_vm7 = vweird.f32 %v1191_v36  ;;  %v1202_v46 = vand.u32 2147483647, %v1191_v36 }
 0x317   : > { %1168 = vmatmul.bf16.vlgmr.msrb.gmra.mxu3 %v447_v31 }
 0x318   : > { %v1205_v51 = vor.u32 1.1754944e-38, %v1204_v41  ;;  %vm1203_vm9 = vcmp.eq.f32.partialorder %v1202_v46, 8.507059e+37 }
 0x31c   : > { %v1577_v11 = vpop.eup %1576 }
 0x31d   : > { %v1194_v19 = vmul.f32 %v1577_v11, %v1191_v36  ;;  %vm1199_vm6 = vweird.f32 %v1577_v11 }
 0x31e   : > { %vm1200_vm8 = vmor %vm1198_vm7, %vm1199_vm6 }
 0x31f   : > { %v1195_v56 = vsub.f32 1.0, %v1194_v19 }
 0x321   : > { %v1196_v49 = vmul.f32 %v1577_v11, %v1195_v56 }
 0x323   : > { %v1197_v32 = vadd.f32 %v1577_v11, %v1196_v49 }
 0x325   : > { %v1201_v22 = vsel %vm1200_vm8, %v1577_v11, %v1197_v32 }
 0x326   : > { %v1206_v60 = vsel %vm1203_vm9, %v1205_v51, %v1201_v22 }
 0x35d   : > { %v1130_v57 = vpop.f32.mrf.mxu2 }
 0x365   : > { %v1132_v18 = vpop.f32.mrf.mxu2 }
 0x37a   : > { %v1143_v10 = vpop.f32.mrf.mxu3 }
 0x37b   : > { %v1144_v8 = vadd.f32 %v1143_v10, %v1130_v57 }
 0x37d   : > { %v1156_v61 = vpop.f32.mrf.mxu2  ;;  %v1173_v6 = vadd.f32 %v1144_v8, %v1087_v5 }
 0x382   : > { %v1145_v43 = vpop.f32.mrf.mxu3 }
 0x385   : > { %v1158_v50 = vpop.f32.mrf.mxu2 }
 0x39a   : > { %v1169_v27 = vpop.f32.mrf.mxu3 }
 0x39b   : > { %v1170_v34 = vadd.f32 %v1169_v27, %v1156_v61 }
 0x39d   : > { %v1174_v39 = vadd.f32 %v1170_v34, %v1088_v9 }
 0x39f   : > { %v1177_v14 = vrot.slane %v1174_v39, 4 }
 0x3a1   : > { %v1178_v58 = vsel %vm521_vm3, %v1173_v6, %v1177_v14 }
 0x3a2   : > { %v1171_v15 = vpop.f32.mrf.mxu3  ;;  %v1207_v31 = vmul.f32 %v1206_v60, %v1178_v58 }
 0x3a4   : > { %1208 = vst [vmem:[%s302_s24] sm:$0xff] %v1207_v31 }
 0x3a5   : > { %1605 = shalt.err (!%p1602_p5)
}
 0x3a6   : > { %1386 = dma.vmem_to_hbm [thread:$0]  (%p1736_p4), %s1226_s30, 128, %s1228_s8, %s1210_s11  }
 0x3a7 PF: > { %p1392_p6 = scmp.ge.s32.totalorder %s1656_s26, 2  ;;  %s1239_s17 = sand.u32 1, %s1636_s21  }
 0x3a8   : > { %s1240_s20 = scalar_lea.sflag [#allocation6], %s1239_s17 }
 0x3a9   : > { %p1389_p7 = pnand %p1392_p6, %p1743_p8 }
 0x3ab   : > { %p1390_p9 = pneg %p1389_p7 }
 0x3ad   : > { %1631 = dma.done.wait (%p1390_p9), %s1240_s20, 128  }
 0x3ae   : > { %1633 = vsyncadd (%p1390_p9), %s1240_s20, 4294967168  ;;  %s19_s26 = sadd.s32 1, %s1656_s26   ;;  %s2545_s21 = smov %s1640_s22 }
 0x3af   : > { %p16_p10 = scmp.ge.s32.totalorder %s19_s26, 4   ;;  %s2546_s22 = smov %s1644_s23 }
 0x3b0   : > { %s2547_s23 = smov %s1749_s10  ;;  %s2548_s24 = smov %s1652_s25 }
 0x3b1   : > { %s2549_s25 = smov %s2551_s29  ;;  %18 = sbr.rel (!%p16_p10) target bundleno = 4 (0x4), region = 90 }
 0x3b6   :  { %1246 = vsyncpa [#allocation6], 1 }
 0x3b7   :  { %1248 = vsyncpa [#allocation6 + $0x1], 1 }

</bundles_post_ra>
